<compile_context>
chip_gen: v7x
topology: tpu7x:2x2x1
jax: 0.10.0
libtpu: 0.0.40
codegen_flags: <defaults>
</compile_context>

<pallas_src>
import math

import jax
import jax.numpy as jnp
from jax import lax
from jax.experimental import pallas as pl
from jax.experimental.pallas import tpu as pltpu

# Bond feature vocabulary sizes (e_map of the molecule dataset):
#   bond type, bond stereo, is_conjugated
EDGE_FEAT_DIMS = [5, 6, 2]


def _round_up(x, m):
    return ((x + m - 1) // m) * m


def _emb_pad_width(emb_dim):
    """Smallest lane-friendly width >= emb_dim (divisor of 128, or multiple of 128)."""
    if emb_dim >= 128:
        return _round_up(emb_dim, 128)
    w = 128
    while w // 2 >= emb_dim:
        w //= 2
    return w


def _default_min_grid_steps():
    # v7x has 2 TensorCores per chip: prefer >=2 grid steps so the
    # ("parallel",) grid axis shards across both.  On single-TC chips
    # (v5e/v6e) use a single step for small inputs (avoids pure per-step
    # pipeline overhead).
    try:
        kind = jax.devices()[0].device_kind.lower()
    except Exception:
        return 2
    return 2 if "v7" in kind else 1


def _bond_encoder_kernel(idx_ref, table_ref, out_ref):
    """One grid step handles a packed tile of edges.

    idx_ref:   (tile_p, n_cols) int32.  Each column's indices already include
               the per-slot offset (slot * v_pad) (and, in the fallback path,
               the per-feature row offset), so a single block-diagonal table
               serves all slots / features.  Hit columns are disjoint.
    table_ref: (k_dim, n_dim) f32 block-diagonal embedding table.
    out_ref:   (tile_p, n_dim) f32 lane-dense output tile.
    """
    idx = idx_ref[...]                          # (tile_p, n_cols) int32
    tile_p, n_cols = idx.shape
    k_dim = table_ref.shape[0]

    # TODO(synk): rely on Mosaic hoisting/folding this loop-invariant iota; a
    # scratch+program_id==0 init would break under "parallel" megacore split.
    lane_iota = lax.broadcasted_iota(jnp.int32, (tile_p, k_dim), 1)

    # Hit columns are disjoint (disjoint slot ranges x disjoint vocab ranges),
    # so OR-ing booleans == summing one-hots; single cast to f32 at the end.
    hot = idx[:, 0][:, None] == lane_iota
    for c in range(1, n_cols):                  # static, tiny (n_slots or n_slots*F)
        hot = jnp.logical_or(hot, idx[:, c][:, None] == lane_iota)
    multihot = hot.astype(jnp.float32)

    # Sum of embedding rows for n_slots edges at once == one MXU matmul.
    out_ref[...] = jnp.dot(multihot, table_ref[...],
                           preferred_element_type=jnp.float32)


def bond_encoder_forward(edge_attr, emb_tables, *, max_tile_e=8192,
                         min_grid_steps=None, max_product_vocab=1024):
    """edge_attr: [E, F] int; emb_tables: list of [dim_f, emb_dim] f32."""
    num_edges, num_feats = edge_attr.shape
    assert num_feats == len(emb_tables)
    emb_dim = int(emb_tables[0].shape[1])
    dims = [int(t.shape[0]) for t in emb_tables]

    if num_edges == 0:                           # empty grid is undefined; guard
        return jnp.zeros((0, emb_dim), jnp.float32)

    if min_grid_steps is None:
        min_grid_steps = _default_min_grid_steps()

    # ---- lane-dense packing geometry ------------------------------------
    emb_pad = _emb_pad_width(emb_dim)
    n_slots = max(1, 128 // emb_pad)

    # ---- fuse the per-feature tables -------------------------------------
    prod_vocab = math.prod(dims)
    if prod_vocab <= max_product_vocab:
        # Product table: one fused lookup per edge.
        # row(i0 + d0*i1 + d0*d1*i2 + ...) = sum_f T_f[i_f]   (trace-time, tiny)
        full = jnp.zeros(tuple(reversed(dims)) + (emb_dim,), jnp.float32)
        for f, t in enumerate(emb_tables):
            shp = [1] * num_feats + [emb_dim]
            shp[num_feats - 1 - f] = dims[f]
            full = full + t.astype(jnp.float32).reshape(shp)
        base_table = full.reshape(prod_vocab, emb_dim)
        strides = []
        s = 1
        for d in dims:
            strides.append(s)
            s *= d
        strides = jnp.asarray(strides, dtype=jnp.int32)
        idx = jnp.sum(edge_attr.astype(jnp.int32) * strides[None, :],
                      axis=1, keepdims=True)                      # [E, 1]
        v_total = prod_vocab
    else:
        # Fallback: concatenated tables, one compare column per (slot, feature).
        base_table = jnp.concatenate(
            [t.astype(jnp.float32) for t in emb_tables], axis=0)
        v_total = int(sum(dims))
        feat_offsets = jnp.asarray(
            [int(sum(dims[:i])) for i in range(num_feats)], jnp.int32)
        idx = edge_attr.astype(jnp.int32) + feat_offsets[None, :]  # [E, F]
    n_feat_cols = int(idx.shape[1])

    # ---- pad the table -----------------------------------------------------
    # Rows: guarantee an all-zero row at index v_total (used by padded edges)
    # and make k_dim = n_slots * v_pad a multiple of 128 (lane-dense one-hot).
    # Cols: pad emb_dim up to emb_pad so the output stays lane-dense.
    v_pad = _round_up(v_total + 1, 8)
    k_dim = _round_up(n_slots * v_pad, 128)
    v_pad = k_dim // n_slots
    n_dim = n_slots * emb_pad

    table = jnp.pad(base_table,
                    ((0, v_pad - v_total), (0, emb_pad - emb_dim)))

    table_packed = jnp.zeros((k_dim, n_dim), jnp.float32)
    for s in range(n_slots):                     # trace-time loop
        table_packed = table_packed.at[
            s * v_pad:(s + 1) * v_pad, s * emb_pad:(s + 1) * emb_pad].set(table)

    # ---- edge tiling -------------------------------------------------------
    # Large tiles amortize the ~0.35 us per-grid-step overhead; keep >= the
    # requested number of grid steps (megacore on v7x); divide the padded edge
    # count evenly across steps to minimize padding waste.
    min_tile = 8 * n_slots                       # keeps tile_p a multiple of 8
    max_tile = max(min_tile, (max_tile_e // min_tile) * min_tile)
    e_pad_min = _round_up(num_edges, min_tile)
    n_steps = max(max(1, int(min_grid_steps)), pl.cdiv(e_pad_min, max_tile))
    tile_e = _round_up(pl.cdiv(e_pad_min, n_steps), min_tile)
    e_pad = tile_e * n_steps

    # Padded edges point at the guaranteed-zero table row -> zero output rows.
    idx = jnp.pad(idx, ((0, e_pad - num_edges), (0, 0)),
                  constant_values=v_total)
    idx = idx.reshape(e_pad // n_slots, n_slots, n_feat_cols)
    slot_off = (jnp.arange(n_slots, dtype=jnp.int32) * v_pad)[None, :, None]
    idx_packed = (idx + slot_off).reshape(e_pad // n_slots,
                                          n_slots * n_feat_cols)

    tile_p = tile_e // n_slots
    grid = (n_steps,)

    out_packed = pl.pallas_call(
        _bond_encoder_kernel,
        out_shape=jax.ShapeDtypeStruct((e_pad // n_slots, n_dim), jnp.float32),
        grid_spec=pltpu.PrefetchScalarGridSpec(
            num_scalar_prefetch=0,
            grid=grid,
            in_specs=[
                pl.BlockSpec((tile_p, n_slots * n_feat_cols), lambda i: (i, 0)),
                pl.BlockSpec((k_dim, n_dim), lambda i: (0, 0)),
            ],
            out_specs=pl.BlockSpec((tile_p, n_dim), lambda i: (i, 0)),
        ),
        compiler_params=pltpu.CompilerParams(
            dimension_semantics=("parallel",),
            vmem_limit_bytes=32 * 1024 * 1024),
    )(idx_packed, table_packed)

    # Row-major reshape back to per-edge rows (free), then slice off padding.
    out = out_packed.reshape(e_pad, emb_pad)
    return out[:num_edges, :emb_dim]


def init_bond_embeddings(key, emb_dim):
    """Xavier-uniform init for each embedding table (deterministic)."""
    tables = []
    for i, dim in enumerate(EDGE_FEAT_DIMS):
        k = jax.random.fold_in(key, i)
        bound = (6.0 / (dim + emb_dim)) ** 0.5
        tables.append(jax.random.uniform(
            k, (dim, emb_dim), jnp.float32, minval=-bound, maxval=bound))
    return tables


def bond_encoder_ref(edge_attr, emb_tables):
    """Plain-JAX reference matching the PyTorch forward."""
    out = 0
    for i, table in enumerate(emb_tables):
        out = out + jnp.take(table, edge_attr[:, i], axis=0)
    return out


def _random_edge_attr(key, num_edges):
    cols = []
    for i, dim in enumerate(EDGE_FEAT_DIMS):
        k = jax.random.fold_in(key, i)
        cols.append(jax.random.randint(k, (num_edges, 1), 0, dim, jnp.int32))
    return jnp.concatenate(cols, axis=1)   # [E, F] int32


if __name__ == "__main__":
    key = jax.random.PRNGKey(0)
    emb_dim = 32
    tables = init_bond_embeddings(key, emb_dim)

    # Case 1: tiny E, not a multiple of the tile (exercises padding).
    edge_attr = _random_edge_attr(jax.random.PRNGKey(1), 14)
    out = jax.block_until_ready(bond_encoder_forward(edge_attr, tables))
    ref = bond_encoder_ref(edge_attr, tables)
    assert out.shape == (14, emb_dim)
    assert jnp.allclose(out, ref, atol=1e-5, rtol=1e-5), "mismatch (E=14)"

    # Case 2: multiple grid steps with a small tile cap (exercises the grid).
    edge_attr2 = _random_edge_attr(jax.random.PRNGKey(2), 70)
    out2 = jax.block_until_ready(
        bond_encoder_forward(edge_attr2, tables, max_tile_e=64,
                             min_grid_steps=1))
    ref2 = bond_encoder_ref(edge_attr2, tables)
    assert out2.shape == (70, emb_dim)
    assert jnp.allclose(out2, ref2, atol=1e-5, rtol=1e-5), "mismatch (E=70)"

    # Case 3: emb_dim that does not divide 128 (exercises the lane-pad guard).
    emb_dim3 = 20
    tables3 = init_bond_embeddings(jax.random.PRNGKey(3), emb_dim3)
    edge_attr3 = _random_edge_attr(jax.random.PRNGKey(4), 19)
    out3 = jax.block_until_ready(bond_encoder_forward(edge_attr3, tables3))
    ref3 = bond_encoder_ref(edge_attr3, tables3)
    assert out3.shape == (19, emb_dim3)
    assert jnp.allclose(out3, ref3, atol=1e-5, rtol=1e-5), "mismatch (emb=20)"

    print("KERNEL_OK")
</pallas_src>

<mosaic_0001>
module attributes {stable_mosaic.version = 11 : i64} {
  func.func @_bond_encoder_kernel(%arg0: i32, %arg1: memref<8x4xi32, #tpu.memory_space<vmem>>, %arg2: memref<256x128xf32, #tpu.memory_space<vmem>>, %arg3: memref<8x128xf32, #tpu.memory_space<vmem>>) attributes {dimension_semantics = [#tpu.dimension_semantics<parallel>], iteration_bounds = array<i64: 1>, scalar_prefetch = 0 : i64, scratch_operands = 0 : i64, tpu.core_type = #tpu.core_type<tc>, window_params = [{transform_indices = @transform_0, window_bounds = array<i64: 8, 4>}, {pipeline_mode = #tpu.pipeline_mode<synchronous>, transform_indices = @transform_1, window_bounds = array<i64: 256, 128>}, {transform_indices = @transform_2, window_bounds = array<i64: 8, 128>}]} {
    %c0 = arith.constant 0 : index
    %c0_0 = arith.constant 0 : index
    %0 = vector.load %arg1[%c0, %c0_0] : memref<8x4xi32, #tpu.memory_space<vmem>>, vector<8x4xi32>
    %1 = tpu.iota {dimensions = array<i32: 1>} : vector<8x256xi32>
    %2 = vector.extract_strided_slice %0 {offsets = [0, 0], sizes = [8, 1], strides = [1, 1]} : vector<8x4xi32> to vector<8x1xi32>
    %3 = vector.shape_cast %2 : vector<8x1xi32> to vector<8xi32>
    %4 = vector.shape_cast %3 : vector<8xi32> to vector<8x1xi32>
    %5 = vector.broadcast %4 : vector<8x1xi32> to vector<8x256xi32>
    %6 = arith.cmpi eq, %5, %1 : vector<8x256xi32>
    %7 = vector.extract_strided_slice %0 {offsets = [0, 1], sizes = [8, 1], strides = [1, 1]} : vector<8x4xi32> to vector<8x1xi32>
    %8 = vector.shape_cast %7 : vector<8x1xi32> to vector<8xi32>
    %9 = vector.shape_cast %8 : vector<8xi32> to vector<8x1xi32>
    %10 = vector.broadcast %9 : vector<8x1xi32> to vector<8x256xi32>
    %11 = arith.cmpi eq, %10, %1 : vector<8x256xi32>
    %12 = arith.ori %6, %11 : vector<8x256xi1>
    %13 = vector.extract_strided_slice %0 {offsets = [0, 2], sizes = [8, 1], strides = [1, 1]} : vector<8x4xi32> to vector<8x1xi32>
    %14 = vector.shape_cast %13 : vector<8x1xi32> to vector<8xi32>
    %15 = vector.shape_cast %14 : vector<8xi32> to vector<8x1xi32>
    %16 = vector.broadcast %15 : vector<8x1xi32> to vector<8x256xi32>
    %17 = arith.cmpi eq, %16, %1 : vector<8x256xi32>
    %18 = arith.ori %12, %17 : vector<8x256xi1>
    %19 = vector.extract_strided_slice %0 {offsets = [0, 3], sizes = [8, 1], strides = [1, 1]} : vector<8x4xi32> to vector<8x1xi32>
    %20 = vector.shape_cast %19 : vector<8x1xi32> to vector<8xi32>
    %21 = vector.shape_cast %20 : vector<8xi32> to vector<8x1xi32>
    %22 = vector.broadcast %21 : vector<8x1xi32> to vector<8x256xi32>
    %23 = arith.cmpi eq, %22, %1 : vector<8x256xi32>
    %24 = arith.ori %18, %23 : vector<8x256xi1>
    %25 = arith.extui %24 : vector<8x256xi1> to vector<8x256xi32>
    %26 = arith.sitofp %25 : vector<8x256xi32> to vector<8x256xf32>
    %c0_1 = arith.constant 0 : index
    %c0_2 = arith.constant 0 : index
    %27 = vector.load %arg2[%c0_1, %c0_2] : memref<256x128xf32, #tpu.memory_space<vmem>>, vector<256x128xf32>
    %cst = arith.constant dense<0.000000e+00> : vector<8x128xf32>
    %28 = tpu.matmul %26, %27, %cst {dimension_numbers = #tpu.dot_dimension_numbers<[1], [0], [0], [1], [0, 0, 1, 1], [], []>} : vector<8x256xf32>, vector<256x128xf32>, vector<8x128xf32> -> vector<8x128xf32>
    %c0_3 = arith.constant 0 : index
    %c0_4 = arith.constant 0 : index
    %29 = vector.load %arg3[%c0_3, %c0_4] : memref<8x128xf32, #tpu.memory_space<vmem>>, vector<8x128xf32>
    tpu.vector_store %arg3[%c0_3, %c0_4], %28 {strides = array<i32>} : memref<8x128xf32, #tpu.memory_space<vmem>>, vector<8x128xf32>,
    return
  }
  func.func @transform_0(%arg0: i32) -> (i32, i32) {
    %c0_i32 = arith.constant 0 : i32
    %c0_i32_0 = arith.constant 0 : i32
    return %arg0, %c0_i32 : i32, i32
  }
  func.func @transform_1(%arg0: i32) -> (i32, i32) {
    %c0_i32 = arith.constant 0 : i32
    %c0_i32_0 = arith.constant 0 : i32
    %c0_i32_1 = arith.constant 0 : i32
    return %c0_i32, %c0_i32_0 : i32, i32
  }
  func.func @transform_2(%arg0: i32) -> (i32, i32) {
    %c0_i32 = arith.constant 0 : i32
    %c0_i32_0 = arith.constant 0 : i32
    return %arg0, %c0_i32 : i32, i32
  }
}

</mosaic_0001>

<bundles_post_ra>
// kernel: tpu_custom_call.1
= control target key start
LH: loop header
LB: loop body
LE: loop exit
PB: predicated region body
PF: predicated region fallthrough
CT: control target
= control target key end

     0   :  { %7 = vsyncpa [#allocation3], 0  ;;  %s362_s0 = inlined_call_operand.vmem [shape: s32[8,4], index: 0, kind: input, shape index: {}]   ;;  %s363_s1 = inlined_call_operand.hbm [shape: f32[256,128], index: 1, kind: input, shape index: {}]   ;;  %s364_s2 = inlined_call_operand.hbm [shape: f32[8,128], index: 2, kind: output, shape index: {}]  }
   0x1   :  { %8 = vsyncpa [#allocation4], 0  ;;  %s311_s9 = smov [#allocation2]   ;;  %s263_s13 = scalar_lea.hbm %s363_s1, 4096 }
   0x2   :  { %s16_s10 = sshll.u32 %s311_s9, 4  ;;  %p264_p0 = scmp.ne.s32.totalorder %s363_s1, %s263_s13  ;;  %s17_s10 = int_to_ptr.vmem [resolvable:$true] %s16_s10 }
   0x3   :  { %p267_p1 = scmp.lt.u32.totalorder %s263_s13, %s363_s1 }
   0x5   :  { %p269_p2 = pnand %p267_p1, %p264_p0 }
   0x7   :  { %272 = shalt.err (!%p269_p2)
}
   0x8   :  { %s273_s18 = scalar_lea.vmem %s17_s10, 4096  ;;  %p278_p4 = scmp.lt.s32.totalorder %s17_s10, %s17_s10 }
   0x9   :  { %p274_p3 = scmp.ne.s32.totalorder %s17_s10, %s273_s18  ;;  %p279_p5 = scmp.lt.s32.totalorder %s273_s18, %s273_s18 }
   0xb   :  { %p280_p6 = por %p279_p5, %p278_p4 }
   0xd   :  { %p281_p7 = pnand %p280_p6, %p274_p3 }
   0xf   :  { %284 = shalt.err (!%p281_p7)
}
  0x10   :  { %s312_s19 = smov 128   ;;  %s313_s20 = smov 8  }
  0x11   :  { %22 = dma.hbm_to_vmem [thread:$0]  %s363_s1, 4096, %s17_s10, [#allocation3], %s312_s19, %s312_s19, %s313_s20  }
  0x12   :  { %307 = dma.done.wait [#allocation3], 4096  }
  0x13   :  { %308 = vsyncadd [#allocation3], 4294963200  ;;  %v314_v0 = vmov 0   ;;  %v315_v1 = vmov 2   ;;  %v26_v2 = vld [vmem:[%s362_s0] sm:$0xff]  ;;  %v77_v4 = vld [vmem:[#allocation2 + $0x88] sm:$0xff]  ;;  %v27_v53 = vlaneseq }
  0x14   :  { %258 = vset.pattern.permute.xlu0 %v314_v0  ;;  %260 = vset.pattern.permute.xlu1 %v315_v1  ;;  %v76_v3 = vld [vmem:[#allocation2 + $0x80] sm:$0xff]  ;;  %v61_v7 = vld [vmem:[#allocation2 + $0x8] sm:$0xff]  ;;  %v78_v8 = vld [vmem:[#allocation2 + $0x90] sm:$0xff]  ;;  %v316_v17 = vmov 1   ;;  %v317_v18 = vmov 3   ;;  %v318_v60 = vmov 1.0  }
  0x15   :  { %31 = vperm.xlu0 %258, %v26_v2   ;;  %43 = vperm.xlu1 %260, %v26_v2   ;;  %v217_v5 = vpack.c.bf16 %v77_v4, %v76_v3  ;;  %v60_v6 = vld [vmem:[#allocation2] sm:$0xff]  ;;  %v79_v10 = vld [vmem:[#allocation2 + $0x98] sm:$0xff]  ;;  %v62_v11 = vld [vmem:[#allocation2 + $0x10] sm:$0xff]  ;;  %v28_v54 = vand.u32 127, %v27_v53  ;;  %s319_s0 = smov [#allocation5]  }
  0x16   :  { %v219_v9 = vpack.c.bf16 %v61_v7, %v60_v6  ;;  %v63_v12 = vld [vmem:[#allocation2 + $0x18] sm:$0xff]  ;;  %v221_v13 = vpack.c.bf16 %v79_v10, %v78_v8  ;;  %v80_v14 = vld [vmem:[#allocation2 + $0xa0] sm:$0xff]  ;;  %v81_v15 = vld [vmem:[#allocation2 + $0xa8] sm:$0xff]  ;;  %s169_s1 = sshll.u32 %s319_s0, 4  ;;  %s170_s1 = int_to_ptr.vmem [resolvable:$true] %s169_s1 }
  0x17   :  { %218 = vmatprep.subr.bf16.mxu0 %v217_v5  ;;  %v223_v16 = vpack.c.bf16 %v63_v12, %v62_v11  ;;  %v225_v19 = vpack.c.bf16 %v81_v15, %v80_v14  ;;  %v64_v20 = vld [vmem:[#allocation2 + $0x20] sm:$0xff]  ;;  %v65_v21 = vld [vmem:[#allocation2 + $0x28] sm:$0xff]  ;;  %v82_v22 = vld [vmem:[#allocation2 + $0xb0] sm:$0xff]  ;;  %v29_v57 = vadd.s32 128, %v28_v54  ;;  %s285_s25 = scalar_lea.vmem %s170_s1, 128  ;;  %p290_p9 = scmp.lt.s32.totalorder %s170_s1, %s170_s1 }
  0x18   :  { %220 = vmatpush3.bf16.msra.mxu0 %v219_v9  ;;  %v83_v23 = vld [vmem:[#allocation2 + $0xb8] sm:$0xff]  ;;  %v227_v24 = vpack.c.bf16 %v65_v21, %v64_v20  ;;  %v66_v26 = vld [vmem:[#allocation2 + $0x30] sm:$0xff]  ;;  %v84_v28 = vld [vmem:[#allocation2 + $0xc0] sm:$0xff]  ;;  %p286_p8 = scmp.ne.s32.totalorder %s170_s1, %s285_s25  ;;  %p291_p10 = scmp.lt.s32.totalorder %s285_s25, %s285_s25 }
  0x19   :  { %259 = vset.pattern.permute.xlu0 %v316_v17  ;;  %261 = vset.pattern.permute.xlu1 %v317_v18  ;;  %v229_v25 = vpack.c.bf16 %v83_v23, %v82_v22  ;;  %v67_v27 = vld [vmem:[#allocation2 + $0x38] sm:$0xff]  ;;  %v85_v29 = vld [vmem:[#allocation2 + $0xc8] sm:$0xff]  ;;  %v68_v32 = vld [vmem:[#allocation2 + $0x40] sm:$0xff] }
  0x1a   :  { %36 = vperm.xlu0 %259, %v26_v2   ;;  %50 = vperm.xlu1 %261, %v26_v2   ;;  %v231_v30 = vpack.c.bf16 %v67_v27, %v66_v26  ;;  %v233_v31 = vpack.c.bf16 %v85_v29, %v84_v28  ;;  %v69_v33 = vld [vmem:[#allocation2 + $0x48] sm:$0xff]  ;;  %v86_v34 = vld [vmem:[#allocation2 + $0xd0] sm:$0xff]  ;;  %v87_v35 = vld [vmem:[#allocation2 + $0xd8] sm:$0xff]  ;;  %p292_p11 = por %p291_p10, %p290_p9 }
  0x1b   :  { %222 = vmatprep.subr.bf16.mxu0 %v221_v13  ;;  %v235_v36 = vpack.c.bf16 %v69_v33, %v68_v32  ;;  %v237_v37 = vpack.c.bf16 %v87_v35, %v86_v34  ;;  %v70_v38 = vld [vmem:[#allocation2 + $0x50] sm:$0xff]  ;;  %v71_v39 = vld [vmem:[#allocation2 + $0x58] sm:$0xff]  ;;  %v88_v40 = vld [vmem:[#allocation2 + $0xe0] sm:$0xff] }
  0x1c   :  { %224 = vmatpush3.bf16.msra.mxu0 %v223_v16  ;;  %v89_v41 = vld [vmem:[#allocation2 + $0xe8] sm:$0xff]  ;;  %v239_v42 = vpack.c.bf16 %v71_v39, %v70_v38  ;;  %v72_v44 = vld [vmem:[#allocation2 + $0x60] sm:$0xff]  ;;  %v90_v46 = vld [vmem:[#allocation2 + $0xf0] sm:$0xff]  ;;  %p293_p12 = pnand %p292_p11, %p286_p8 }
  0x1d   :  { %226 = vmatprep.subr.bf16.mxu0 %v225_v19  ;;  %v241_v43 = vpack.c.bf16 %v89_v41, %v88_v40  ;;  %v73_v45 = vld [vmem:[#allocation2 + $0x68] sm:$0xff]  ;;  %v91_v47 = vld [vmem:[#allocation2 + $0xf8] sm:$0xff]  ;;  %v74_v50 = vld [vmem:[#allocation2 + $0x70] sm:$0xff] }
  0x1e   :  { %262 = vset.pattern.permute.xlu0 %v317_v18  ;;  %v243_v48 = vpack.c.bf16 %v73_v45, %v72_v44  ;;  %v245_v49 = vpack.c.bf16 %v91_v47, %v90_v46  ;;  %v75_v51 = vld [vmem:[#allocation2 + $0x78] sm:$0xff] }
  0x1f   :  { %v247_v52 = vpack.c.bf16 %v75_v51, %v74_v50 }
  0x20   :  { %228 = vmatpush3.bf16.msra.mxu0 %v227_v24 }
  0x21   :  { %230 = vmatprep.subr.bf16.mxu0 %v229_v25 }
  0x24   :  { %232 = vmatpush3.bf16.msra.mxu0 %v231_v30 }
  0x25   :  { %234 = vmatprep.subr.bf16.mxu0 %v233_v31 }
  0x28   :  { %236 = vmatpush3.bf16.msra.mxu0 %v235_v36 }
  0x29   :  { %238 = vmatprep.subr.bf16.mxu0 %v237_v37 }
  0x2c   :  { %240 = vmatpush3.bf16.msra.mxu0 %v239_v42 }
  0x2d   :  { %242 = vmatprep.subr.bf16.mxu0 %v241_v43 }
  0x30   :  { %244 = vmatpush3.bf16.msra.mxu0 %v243_v48 }
  0x31   :  { %246 = vmatprep.subr.bf16.mxu0 %v245_v49 }
  0x34   :  { %248 = vmatpush3.bf16.msra.mxu0 %v247_v52 }
  0x94   :  { %v32_v55 = vpop.permute.xlu0 %31  ;;  %v44_v56 = vpop.permute.xlu1 %43 }
  0x95   :  { %vm33_vm0 = vcmp.eq.s32.totalorder %v32_v55, %v28_v54  ;;  %vm34_vm3 = vcmp.eq.s32.totalorder %v32_v55, %v29_v57  ;;  %vm45_vm6 = vcmp.eq.s32.totalorder %v44_v56, %v28_v54  ;;  %vm46_vm10 = vcmp.eq.s32.totalorder %v44_v56, %v29_v57 }
  0x99   :  { %v37_v58 = vpop.permute.xlu0 %36  ;;  %v51_v59 = vpop.permute.xlu1 %50 }
  0x9a   :  { %vm38_vm1 = vcmp.eq.s32.totalorder %v37_v58, %v28_v54  ;;  %vm39_vm2 = vcmp.eq.s32.totalorder %v37_v58, %v29_v57  ;;  %vm52_vm5 = vcmp.eq.s32.totalorder %v51_v59, %v28_v54  ;;  %vm53_vm9 = vcmp.eq.s32.totalorder %v51_v59, %v29_v57 }
  0x9b   :  { %vm40_vm4 = vmor %vm33_vm0, %vm38_vm1 }
  0x9c   :  { %vm41_vm7 = vmor %vm34_vm3, %vm39_vm2 }
  0x9d   :  { %vm47_vm8 = vmor %vm40_vm4, %vm45_vm6 }
  0x9e   :  { %vm54_vm11 = vmor %vm47_vm8, %vm52_vm5 }
  0x9f   :  { %vm48_vm12 = vmor %vm41_vm7, %vm46_vm10 }
  0xa0   :  { %vm55_vm13 = vmor %vm48_vm12, %vm53_vm9 }
  0xa1   :  { %180 = vmatprep.mubr.msk.f32.mxu0 %vm55_vm13, %v318_v60 }
  0xa2   :  { %181 = vmatmul.mubr.msk.f32.vlgmr.msra.gmra.mrb[0].mxu0 %vm54_vm11, %v318_v60 }
 0x175   :  { %v214_v61 = vpop.f32.mrb[0].mxu0 }
 0x176   :  { %v215_v62 = vpop.f32.mrb[1].mxu0 }
 0x177   :  { %v216_v63 = vadd.f32 %v215_v62, %v214_v61 }
 0x179   :  { %162 = vst [vmem:[#allocation5] sm:$0xff] %v216_v63 }
 0x17a   :  { %296 = shalt.err (!%p293_p12)
}
 0x17b   :  { %s297_s28 = scalar_lea.hbm %s364_s2, 128 }
 0x17c   :  { %p298_p13 = scmp.ne.s32.totalorder %s364_s2, %s297_s28  ;;  %p301_p0 = scmp.lt.u32.totalorder %s297_s28, %s364_s2 }
 0x17e   :  { %p303_p1 = pnand %p301_p0, %p298_p13 }
 0x180   :  { %306 = shalt.err (!%p303_p1)
}
 0x181   :  { %172 = dma.vmem_to_hbm [thread:$0]  %s170_s1, 128, %s364_s2, [#allocation4]  }
 0x182   :  { %309 = dma.done.wait [#allocation4], 128  }
 0x183   :  { %310 = vsyncadd [#allocation4], 4294967168 }
 0x184   :  { %176 = vsyncpa [#allocation3], 1 }
 0x185   :  { %177 = vsyncpa [#allocation4], 1 }

</bundles_post_ra>
